<compile_context>
chip_gen: v7x
topology: tpu7x:2x2x1
jax: 0.10.0
libtpu: 0.0.40
codegen_flags: <defaults>
</compile_context>

<pallas_src>
import functools
import math

import jax
import jax.numpy as jnp
from jax.experimental import pallas as pl
from jax.experimental.pallas import tpu as pltpu


def _mhsa_kernel(x_ref, wq_ref, wk_ref, wv_ref, bq_ref, bk_ref, bv_ref,
                 wp_ref, bp_ref, o_ref, *, num_heads, head_dim, bblk, seq_len):
    H, hd, N = num_heads, head_dim, seq_len
    rows = bblk * N

    xs = x_ref[...]                                           # (rows, C_in_pad) bf16

    # Fused projections: one wide MXU matmul per tensor (heads on the lane
    # axis); bf16 operands, f32 accumulation.  Scale is folded into Wq/bq
    # in the wrapper; biases added once, outside the head loop.
    q = jnp.dot(xs, wq_ref[...], preferred_element_type=jnp.float32) + bq_ref[...]
    k = jnp.dot(xs, wk_ref[...], preferred_element_type=jnp.float32) + bk_ref[...]
    v = jnp.dot(xs, wv_ref[...], preferred_element_type=jnp.float32) + bv_ref[...]

    # bf16 operands for the attention matmuls (MXU), f32 accumulation.
    qb = q.astype(jnp.bfloat16)
    kb = k.astype(jnp.bfloat16)
    vb = v.astype(jnp.bfloat16)

    ctx_heads = []
    for h in range(H):                       # small static loop; projections hoisted
        lo = h * hd
        qh = qb[:, lo:lo + hd].reshape(bblk, N, hd)
        kh = kb[:, lo:lo + hd].reshape(bblk, N, hd)
        vh = vb[:, lo:lo + hd].reshape(bblk, N, hd)

        s = jnp.einsum('bqd,bkd->bqk', qh, kh,
                       preferred_element_type=jnp.float32)    # (bblk, N, N)
        s = s - jnp.max(s, axis=-1, keepdims=True)
        p = jnp.exp(s)
        p = p * pl.reciprocal(jnp.sum(p, axis=-1, keepdims=True), approx=True)
        # TODO(synk): training-mode stochastic attention dropout not implemented
        ctx = jnp.einsum('bqk,bkd->bqd', p.astype(jnp.bfloat16), vh,
                         preferred_element_type=jnp.float32)  # (bblk, N, hd)
        ctx_heads.append(ctx.reshape(rows, hd))

    # Heads back on the lane axis (head-major, matching torch's
    # transpose(1,2).reshape(B,N,C)), then one wide output projection into a
    # lane-dense padded width.
    ctx2 = jnp.concatenate(ctx_heads, axis=-1).astype(jnp.bfloat16)   # (rows, C)
    out = jnp.dot(ctx2, wp_ref[...], preferred_element_type=jnp.float32) + bp_ref[...]
    o_ref[...] = out.astype(o_ref.dtype)                       # unmasked (rows, C_out_pad)


def _choose_batch_block(B, N):
    """Largest batch block (divisor of B) that keeps ~<=512 rows per step,
    leaves >=2 grid steps when B allows (two v7x TensorCores), and keeps the
    per-step row count sublane-aligned unless the block covers everything."""
    target_rows = 512
    divisors = [d for d in range(1, B + 1) if B % d == 0]
    cand = [d for d in divisors if B // d >= 2] or divisors
    cand = [d for d in cand if (d * N) % 8 == 0 or d == B] or [B]
    ok = [d for d in cand if d * N <= target_rows]
    return max(ok) if ok else min(cand)


def multi_head_self_attention(x, w_qkv, b_qkv, w_proj, b_proj, num_heads):
    """x: (B, N, C); w_qkv: (3C, C); b_qkv: (3C,); w_proj: (C, C); b_proj: (C,)."""
    B, N, C = x.shape
    assert C % num_heads == 0
    H = num_heads
    hd = C // H
    scale = hd ** (-0.5)

    LANE = 128
    C_in_pad = ((C + LANE - 1) // LANE) * LANE      # padded contraction width
    C_out_pad = ((C + LANE - 1) // LANE) * LANE     # lane-dense output width

    f32, bf16 = jnp.float32, jnp.bfloat16
    w_qkv = jnp.asarray(w_qkv, f32)
    b_qkv = jnp.asarray(b_qkv, f32)
    w_proj = jnp.asarray(w_proj, f32)
    b_proj = jnp.asarray(b_proj, f32)

    # Fused per-tensor weights, heads on the lane axis (head-major order
    # matches torch's reshape(B, N, 3, H, hd)).  The contraction (input-C)
    # axis is zero-padded to the 128-lane width of the padded x block.
    w_all = w_qkv.T.reshape(C, 3, C)                 # (C_in, kind, H*hd)

    def _prep_w(kind, s):
        w = w_all[:, kind, :] * s                    # (C, C)
        return jnp.pad(w, ((0, C_in_pad - C), (0, 0))).astype(bf16)

    wq = _prep_w(0, scale)                           # (C_in_pad, C) scale folded
    wk = _prep_w(1, 1.0)
    wv = _prep_w(2, 1.0)

    b_all = b_qkv.reshape(3, 1, C)
    bq = b_all[0] * scale                            # (1, C) f32, scale folded
    bk = b_all[1]
    bv = b_all[2]

    wp = jnp.pad(w_proj.T, ((0, 0), (0, C_out_pad - C))).astype(bf16)   # (C, C_out_pad)
    bp = jnp.pad(b_proj, (0, C_out_pad - C)).reshape(1, C_out_pad)      # (1, C_out_pad) f32

    bblk = _choose_batch_block(B, N)
    steps = B // bblk
    rows = bblk * N

    # Batch folded into rows; channel axis zero-padded to 128 lanes and
    # pre-cast to bf16 to halve the streamed input DMA.
    x2 = jnp.pad(x.reshape(B * N, C), ((0, 0), (0, C_in_pad - C))).astype(bf16)

    kernel = functools.partial(_mhsa_kernel, num_heads=H, head_dim=hd,
                               bblk=bblk, seq_len=N)

    out = pl.pallas_call(
        kernel,
        out_shape=jax.ShapeDtypeStruct((B * N, C_out_pad), x.dtype),
        grid_spec=pltpu.PrefetchScalarGridSpec(
            num_scalar_prefetch=0,
            grid=(steps,),
            in_specs=[
                pl.BlockSpec((rows, C_in_pad), lambda i: (i, 0)),     # x row slab
                pl.BlockSpec((C_in_pad, C), lambda i: (0, 0)),        # Wq (scaled, fused heads)
                pl.BlockSpec((C_in_pad, C), lambda i: (0, 0)),        # Wk
                pl.BlockSpec((C_in_pad, C), lambda i: (0, 0)),        # Wv
                pl.BlockSpec((1, C), lambda i: (0, 0)),               # bq (scaled)
                pl.BlockSpec((1, C), lambda i: (0, 0)),               # bk
                pl.BlockSpec((1, C), lambda i: (0, 0)),               # bv
                pl.BlockSpec((C, C_out_pad), lambda i: (0, 0)),       # Wp (lane padded)
                pl.BlockSpec((1, C_out_pad), lambda i: (0, 0)),       # bp (lane padded)
            ],
            out_specs=pl.BlockSpec((rows, C_out_pad), lambda i: (i, 0)),
        ),
        compiler_params=pltpu.CompilerParams(
            dimension_semantics=("parallel",),
            vmem_limit_bytes=64 * 1024 * 1024),
    )(x2, wq, wk, wv, bq, bk, bv, wp, bp)

    return out[:, :C].reshape(B, N, C)


def _reference(x, w_qkv, b_qkv, w_proj, b_proj, num_heads):
    """Plain-JAX replica of the PyTorch forward (eval mode) for verification."""
    B, N, C = x.shape
    hd = C // num_heads
    scale = hd ** (-0.5)
    qkv = x @ w_qkv.T + b_qkv                                # (B, N, 3C)
    qkv = qkv.reshape(B, N, 3, num_heads, hd).transpose(2, 0, 3, 1, 4)
    q, k, v = qkv[0], qkv[1], qkv[2]                          # (B, H, N, hd)
    attn = jnp.einsum('bhnd,bhmd->bhnm', q, k) * scale
    attn = jax.nn.softmax(attn, axis=-1)
    out = jnp.einsum('bhnm,bhmd->bhnd', attn, v)              # (B, H, N, hd)
    out = out.transpose(0, 2, 1, 3).reshape(B, N, C)
    return out @ w_proj.T + b_proj


if __name__ == "__main__":
    B, N, C = 2, 8, 48          # embed_dim=48 divisible by num_heads=3
    num_heads = 3

    key = jax.random.PRNGKey(0)
    kx, k1, k2, k3, k4 = jax.random.split(key, 5)

    x = jax.random.normal(kx, (B, N, C), dtype=jnp.float32)

    # Deterministic xavier-uniform-ish init for the linear layers.
    lim_qkv = math.sqrt(6.0 / (C + 3 * C))
    lim_proj = math.sqrt(6.0 / (C + C))
    w_qkv = jax.random.uniform(k1, (3 * C, C), minval=-lim_qkv, maxval=lim_qkv)
    b_qkv = jax.random.uniform(k2, (3 * C,), minval=-0.1, maxval=0.1)
    w_proj = jax.random.uniform(k3, (C, C), minval=-lim_proj, maxval=lim_proj)
    b_proj = jax.random.uniform(k4, (C,), minval=-0.1, maxval=0.1)

    out = multi_head_self_attention(x, w_qkv, b_qkv, w_proj, b_proj, num_heads)
    out = jax.block_until_ready(out)

    ref = _reference(x, w_qkv, b_qkv, w_proj, b_proj, num_heads)
    assert out.shape == (B, N, C)
    # bf16 MXU operands (f32 accumulation) -> loosened tolerance vs f32 reference.
    assert jnp.allclose(out, ref, atol=5e-2, rtol=5e-2)

    print("KERNEL_OK")
</pallas_src>

<mosaic_0001>
module attributes {stable_mosaic.version = 11 : i64} {
  func.func @_mhsa_kernel(%arg0: i32, %arg1: memref<8x128xbf16, #tpu.memory_space<vmem>>, %arg2: memref<128x48xbf16, #tpu.memory_space<vmem>>, %arg3: memref<128x48xbf16, #tpu.memory_space<vmem>>, %arg4: memref<128x48xbf16, #tpu.memory_space<vmem>>, %arg5: memref<1x48xf32, #tpu.memory_space<vmem>>, %arg6: memref<1x48xf32, #tpu.memory_space<vmem>>, %arg7: memref<1x48xf32, #tpu.memory_space<vmem>>, %arg8: memref<48x128xbf16, #tpu.memory_space<vmem>>, %arg9: memref<1x128xf32, #tpu.memory_space<vmem>>, %arg10: memref<8x128xf32, #tpu.memory_space<vmem>>) attributes {dimension_semantics = [#tpu.dimension_semantics<parallel>], iteration_bounds = array<i64: 2>, scalar_prefetch = 0 : i64, scratch_operands = 0 : i64, tpu.core_type = #tpu.core_type<tc>, window_params = [{transform_indices = @transform_0, window_bounds = array<i64: 8, 128>}, {pipeline_mode = #tpu.pipeline_mode<synchronous>, transform_indices = @transform_1, window_bounds = array<i64: 128, 48>}, {pipeline_mode = #tpu.pipeline_mode<synchronous>, transform_indices = @transform_2, window_bounds = array<i64: 128, 48>}, {pipeline_mode = #tpu.pipeline_mode<synchronous>, transform_indices = @transform_3, window_bounds = array<i64: 128, 48>}, {pipeline_mode = #tpu.pipeline_mode<synchronous>, transform_indices = @transform_4, window_bounds = array<i64: 1, 48>}, {pipeline_mode = #tpu.pipeline_mode<synchronous>, transform_indices = @transform_5, window_bounds = array<i64: 1, 48>}, {pipeline_mode = #tpu.pipeline_mode<synchronous>, transform_indices = @transform_6, window_bounds = array<i64: 1, 48>}, {pipeline_mode = #tpu.pipeline_mode<synchronous>, transform_indices = @transform_7, window_bounds = array<i64: 48, 128>}, {pipeline_mode = #tpu.pipeline_mode<synchronous>, transform_indices = @transform_8, window_bounds = array<i64: 1, 128>}, {transform_indices = @transform_9, window_bounds = array<i64: 8, 128>}]} {
    %c0 = arith.constant 0 : index
    %c0_0 = arith.constant 0 : index
    %0 = vector.load %arg1[%c0, %c0_0] : memref<8x128xbf16, #tpu.memory_space<vmem>>, vector<8x128xbf16>
    %c0_1 = arith.constant 0 : index
    %c0_2 = arith.constant 0 : index
    %1 = vector.load %arg2[%c0_1, %c0_2] : memref<128x48xbf16, #tpu.memory_space<vmem>>, vector<128x48xbf16>
    %cst = arith.constant dense<0.000000e+00> : vector<8x48xf32>
    %2 = tpu.matmul %0, %1, %cst {dimension_numbers = #tpu.dot_dimension_numbers<[1], [0], [0], [1], [0, 0, 1, 1], [], []>} : vector<8x128xbf16>, vector<128x48xbf16>, vector<8x48xf32> -> vector<8x48xf32>
    %c0_3 = arith.constant 0 : index
    %c0_4 = arith.constant 0 : index
    %3 = vector.load %arg5[%c0_3, %c0_4] : memref<1x48xf32, #tpu.memory_space<vmem>>, vector<1x48xf32>
    %4 = vector.broadcast %3 : vector<1x48xf32> to vector<8x48xf32>
    %5 = arith.addf %2, %4 : vector<8x48xf32>
    %c0_5 = arith.constant 0 : index
    %c0_6 = arith.constant 0 : index
    %6 = vector.load %arg3[%c0_5, %c0_6] : memref<128x48xbf16, #tpu.memory_space<vmem>>, vector<128x48xbf16>
    %cst_7 = arith.constant dense<0.000000e+00> : vector<8x48xf32>
    %7 = tpu.matmul %0, %6, %cst_7 {dimension_numbers = #tpu.dot_dimension_numbers<[1], [0], [0], [1], [0, 0, 1, 1], [], []>} : vector<8x128xbf16>, vector<128x48xbf16>, vector<8x48xf32> -> vector<8x48xf32>
    %c0_8 = arith.constant 0 : index
    %c0_9 = arith.constant 0 : index
    %8 = vector.load %arg6[%c0_8, %c0_9] : memref<1x48xf32, #tpu.memory_space<vmem>>, vector<1x48xf32>
    %9 = vector.broadcast %8 : vector<1x48xf32> to vector<8x48xf32>
    %10 = arith.addf %7, %9 : vector<8x48xf32>
    %c0_10 = arith.constant 0 : index
    %c0_11 = arith.constant 0 : index
    %11 = vector.load %arg4[%c0_10, %c0_11] : memref<128x48xbf16, #tpu.memory_space<vmem>>, vector<128x48xbf16>
    %cst_12 = arith.constant dense<0.000000e+00> : vector<8x48xf32>
    %12 = tpu.matmul %0, %11, %cst_12 {dimension_numbers = #tpu.dot_dimension_numbers<[1], [0], [0], [1], [0, 0, 1, 1], [], []>} : vector<8x128xbf16>, vector<128x48xbf16>, vector<8x48xf32> -> vector<8x48xf32>
    %c0_13 = arith.constant 0 : index
    %c0_14 = arith.constant 0 : index
    %13 = vector.load %arg7[%c0_13, %c0_14] : memref<1x48xf32, #tpu.memory_space<vmem>>, vector<1x48xf32>
    %14 = vector.broadcast %13 : vector<1x48xf32> to vector<8x48xf32>
    %15 = arith.addf %12, %14 : vector<8x48xf32>
    %16 = arith.truncf %5 : vector<8x48xf32> to vector<8x48xbf16>
    %17 = arith.truncf %10 : vector<8x48xf32> to vector<8x48xbf16>
    %18 = arith.truncf %15 : vector<8x48xf32> to vector<8x48xbf16>
    %19 = vector.extract_strided_slice %16 {offsets = [0, 0], sizes = [8, 16], strides = [1, 1]} : vector<8x48xbf16> to vector<8x16xbf16>
    %20 = vector.shape_cast %19 : vector<8x16xbf16> to vector<1x8x16xbf16>
    %21 = vector.extract_strided_slice %17 {offsets = [0, 0], sizes = [8, 16], strides = [1, 1]} : vector<8x48xbf16> to vector<8x16xbf16>
    %22 = vector.shape_cast %21 : vector<8x16xbf16> to vector<1x8x16xbf16>
    %23 = vector.extract_strided_slice %18 {offsets = [0, 0], sizes = [8, 16], strides = [1, 1]} : vector<8x48xbf16> to vector<8x16xbf16>
    %24 = vector.shape_cast %23 : vector<8x16xbf16> to vector<1x8x16xbf16>
    "tpu.trace_start"() <{level = 10 : i32, message = "bqd,bkd->bqk"}> : () -> ()
    %cst_15 = arith.constant dense<0.000000e+00> : vector<1x8x8xf32>
    %25 = tpu.matmul %20, %22, %cst_15 {dimension_numbers = #tpu.dot_dimension_numbers<[2], [2], [1], [1], [0, 0, 0, 1, 1, 1], [0], [0]>} : vector<1x8x16xbf16>, vector<1x8x16xbf16>, vector<1x8x8xf32> -> vector<1x8x8xf32>
    "tpu.trace_stop"() : () -> ()
    %cst_16 = arith.constant dense<0xFF800000> : vector<1x8xf32>
    %26 = vector.multi_reduction <maximumf>, %25, %cst_16 [2] : vector<1x8x8xf32> to vector<1x8xf32>
    %27 = vector.shape_cast %26 : vector<1x8xf32> to vector<1x8x1xf32>
    %28 = vector.broadcast %27 : vector<1x8x1xf32> to vector<1x8x8xf32>
    %29 = arith.subf %25, %28 : vector<1x8x8xf32>
    %30 = math.exp %29 : vector<1x8x8xf32>
    %cst_17 = arith.constant dense<0.000000e+00> : vector<1x8xf32>
    %31 = vector.multi_reduction <add>, %30, %cst_17 [2] : vector<1x8x8xf32> to vector<1x8xf32>
    %32 = vector.shape_cast %31 : vector<1x8xf32> to vector<1x8x1xf32>
    %33 = tpu.reciprocal %32 {approx = true} : vector<1x8x1xf32> -> vector<1x8x1xf32>
    %34 = vector.broadcast %33 : vector<1x8x1xf32> to vector<1x8x8xf32>
    %35 = arith.mulf %30, %34 : vector<1x8x8xf32>
    %36 = arith.truncf %35 : vector<1x8x8xf32> to vector<1x8x8xbf16>
    "tpu.trace_start"() <{level = 10 : i32, message = "bqk,bkd->bqd"}> : () -> ()
    %cst_18 = arith.constant dense<0.000000e+00> : vector<1x8x16xf32>
    %37 = tpu.matmul %36, %24, %cst_18 {dimension_numbers = #tpu.dot_dimension_numbers<[2], [1], [1], [2], [0, 0, 0, 1, 1, 2], [0], [0]>} : vector<1x8x8xbf16>, vector<1x8x16xbf16>, vector<1x8x16xf32> -> vector<1x8x16xf32>
    "tpu.trace_stop"() : () -> ()
    %38 = vector.shape_cast %37 : vector<1x8x16xf32> to vector<8x16xf32>
    %39 = vector.extract_strided_slice %16 {offsets = [0, 16], sizes = [8, 16], strides = [1, 1]} : vector<8x48xbf16> to vector<8x16xbf16>
    %40 = vector.shape_cast %39 : vector<8x16xbf16> to vector<1x8x16xbf16>
    %41 = vector.extract_strided_slice %17 {offsets = [0, 16], sizes = [8, 16], strides = [1, 1]} : vector<8x48xbf16> to vector<8x16xbf16>
    %42 = vector.shape_cast %41 : vector<8x16xbf16> to vector<1x8x16xbf16>
    %43 = vector.extract_strided_slice %18 {offsets = [0, 16], sizes = [8, 16], strides = [1, 1]} : vector<8x48xbf16> to vector<8x16xbf16>
    %44 = vector.shape_cast %43 : vector<8x16xbf16> to vector<1x8x16xbf16>
    "tpu.trace_start"() <{level = 10 : i32, message = "bqd,bkd->bqk"}> : () -> ()
    %cst_19 = arith.constant dense<0.000000e+00> : vector<1x8x8xf32>
    %45 = tpu.matmul %40, %42, %cst_19 {dimension_numbers = #tpu.dot_dimension_numbers<[2], [2], [1], [1], [0, 0, 0, 1, 1, 1], [0], [0]>} : vector<1x8x16xbf16>, vector<1x8x16xbf16>, vector<1x8x8xf32> -> vector<1x8x8xf32>
    "tpu.trace_stop"() : () -> ()
    %cst_20 = arith.constant dense<0xFF800000> : vector<1x8xf32>
    %46 = vector.multi_reduction <maximumf>, %45, %cst_20 [2] : vector<1x8x8xf32> to vector<1x8xf32>
    %47 = vector.shape_cast %46 : vector<1x8xf32> to vector<1x8x1xf32>
    %48 = vector.broadcast %47 : vector<1x8x1xf32> to vector<1x8x8xf32>
    %49 = arith.subf %45, %48 : vector<1x8x8xf32>
    %50 = math.exp %49 : vector<1x8x8xf32>
    %cst_21 = arith.constant dense<0.000000e+00> : vector<1x8xf32>
    %51 = vector.multi_reduction <add>, %50, %cst_21 [2] : vector<1x8x8xf32> to vector<1x8xf32>
    %52 = vector.shape_cast %51 : vector<1x8xf32> to vector<1x8x1xf32>
    %53 = tpu.reciprocal %52 {approx = true} : vector<1x8x1xf32> -> vector<1x8x1xf32>
    %54 = vector.broadcast %53 : vector<1x8x1xf32> to vector<1x8x8xf32>
    %55 = arith.mulf %50, %54 : vector<1x8x8xf32>
    %56 = arith.truncf %55 : vector<1x8x8xf32> to vector<1x8x8xbf16>
    "tpu.trace_start"() <{level = 10 : i32, message = "bqk,bkd->bqd"}> : () -> ()
    %cst_22 = arith.constant dense<0.000000e+00> : vector<1x8x16xf32>
    %57 = tpu.matmul %56, %44, %cst_22 {dimension_numbers = #tpu.dot_dimension_numbers<[2], [1], [1], [2], [0, 0, 0, 1, 1, 2], [0], [0]>} : vector<1x8x8xbf16>, vector<1x8x16xbf16>, vector<1x8x16xf32> -> vector<1x8x16xf32>
    "tpu.trace_stop"() : () -> ()
    %58 = vector.shape_cast %57 : vector<1x8x16xf32> to vector<8x16xf32>
    %59 = vector.extract_strided_slice %16 {offsets = [0, 32], sizes = [8, 16], strides = [1, 1]} : vector<8x48xbf16> to vector<8x16xbf16>
    %60 = vector.shape_cast %59 : vector<8x16xbf16> to vector<1x8x16xbf16>
    %61 = vector.extract_strided_slice %17 {offsets = [0, 32], sizes = [8, 16], strides = [1, 1]} : vector<8x48xbf16> to vector<8x16xbf16>
    %62 = vector.shape_cast %61 : vector<8x16xbf16> to vector<1x8x16xbf16>
    %63 = vector.extract_strided_slice %18 {offsets = [0, 32], sizes = [8, 16], strides = [1, 1]} : vector<8x48xbf16> to vector<8x16xbf16>
    %64 = vector.shape_cast %63 : vector<8x16xbf16> to vector<1x8x16xbf16>
    "tpu.trace_start"() <{level = 10 : i32, message = "bqd,bkd->bqk"}> : () -> ()
    %cst_23 = arith.constant dense<0.000000e+00> : vector<1x8x8xf32>
    %65 = tpu.matmul %60, %62, %cst_23 {dimension_numbers = #tpu.dot_dimension_numbers<[2], [2], [1], [1], [0, 0, 0, 1, 1, 1], [0], [0]>} : vector<1x8x16xbf16>, vector<1x8x16xbf16>, vector<1x8x8xf32> -> vector<1x8x8xf32>
    "tpu.trace_stop"() : () -> ()
    %cst_24 = arith.constant dense<0xFF800000> : vector<1x8xf32>
    %66 = vector.multi_reduction <maximumf>, %65, %cst_24 [2] : vector<1x8x8xf32> to vector<1x8xf32>
    %67 = vector.shape_cast %66 : vector<1x8xf32> to vector<1x8x1xf32>
    %68 = vector.broadcast %67 : vector<1x8x1xf32> to vector<1x8x8xf32>
    %69 = arith.subf %65, %68 : vector<1x8x8xf32>
    %70 = math.exp %69 : vector<1x8x8xf32>
    %cst_25 = arith.constant dense<0.000000e+00> : vector<1x8xf32>
    %71 = vector.multi_reduction <add>, %70, %cst_25 [2] : vector<1x8x8xf32> to vector<1x8xf32>
    %72 = vector.shape_cast %71 : vector<1x8xf32> to vector<1x8x1xf32>
    %73 = tpu.reciprocal %72 {approx = true} : vector<1x8x1xf32> -> vector<1x8x1xf32>
    %74 = vector.broadcast %73 : vector<1x8x1xf32> to vector<1x8x8xf32>
    %75 = arith.mulf %70, %74 : vector<1x8x8xf32>
    %76 = arith.truncf %75 : vector<1x8x8xf32> to vector<1x8x8xbf16>
    "tpu.trace_start"() <{level = 10 : i32, message = "bqk,bkd->bqd"}> : () -> ()
    %cst_26 = arith.constant dense<0.000000e+00> : vector<1x8x16xf32>
    %77 = tpu.matmul %76, %64, %cst_26 {dimension_numbers = #tpu.dot_dimension_numbers<[2], [1], [1], [2], [0, 0, 0, 1, 1, 2], [0], [0]>} : vector<1x8x8xbf16>, vector<1x8x16xbf16>, vector<1x8x16xf32> -> vector<1x8x16xf32>
    "tpu.trace_stop"() : () -> ()
    %78 = vector.shape_cast %77 : vector<1x8x16xf32> to vector<8x16xf32>
    %79 = tpu.concatenate %38, %58, %78 in 1 : vector<8x16xf32>, vector<8x16xf32>, vector<8x16xf32> -> vector<8x48xf32>
    %80 = arith.truncf %79 : vector<8x48xf32> to vector<8x48xbf16>
    %c0_27 = arith.constant 0 : index
    %c0_28 = arith.constant 0 : index
    %81 = vector.load %arg8[%c0_27, %c0_28] : memref<48x128xbf16, #tpu.memory_space<vmem>>, vector<48x128xbf16>
    %cst_29 = arith.constant dense<0.000000e+00> : vector<8x128xf32>
    %82 = tpu.matmul %80, %81, %cst_29 {dimension_numbers = #tpu.dot_dimension_numbers<[1], [0], [0], [1], [0, 0, 1, 1], [], []>} : vector<8x48xbf16>, vector<48x128xbf16>, vector<8x128xf32> -> vector<8x128xf32>
    %c0_30 = arith.constant 0 : index
    %c0_31 = arith.constant 0 : index
    %83 = vector.load %arg9[%c0_30, %c0_31] : memref<1x128xf32, #tpu.memory_space<vmem>>, vector<1x128xf32>
    %84 = vector.broadcast %83 : vector<1x128xf32> to vector<8x128xf32>
    %85 = arith.addf %82, %84 : vector<8x128xf32>
    %c0_32 = arith.constant 0 : index
    %c0_33 = arith.constant 0 : index
    %86 = vector.load %arg10[%c0_32, %c0_33] : memref<8x128xf32, #tpu.memory_space<vmem>>, vector<8x128xf32>
    tpu.vector_store %arg10[%c0_32, %c0_33], %85 {strides = array<i32>} : memref<8x128xf32, #tpu.memory_space<vmem>>, vector<8x128xf32>,
    return
  }
  func.func @transform_0(%arg0: i32) -> (i32, i32) {
    %c0_i32 = arith.constant 0 : i32
    %c0_i32_0 = arith.constant 0 : i32
    return %arg0, %c0_i32 : i32, i32
  }
  func.func @transform_1(%arg0: i32) -> (i32, i32) {
    %c0_i32 = arith.constant 0 : i32
    %c0_i32_0 = arith.constant 0 : i32
    %c0_i32_1 = arith.constant 0 : i32
    return %c0_i32, %c0_i32_0 : i32, i32
  }
  func.func @transform_2(%arg0: i32) -> (i32, i32) {
    %c0_i32 = arith.constant 0 : i32
    %c0_i32_0 = arith.constant 0 : i32
    %c0_i32_1 = arith.constant 0 : i32
    return %c0_i32, %c0_i32_0 : i32, i32
  }
  func.func @transform_3(%arg0: i32) -> (i32, i32) {
    %c0_i32 = arith.constant 0 : i32
    %c0_i32_0 = arith.constant 0 : i32
    %c0_i32_1 = arith.constant 0 : i32
    return %c0_i32, %c0_i32_0 : i32, i32
  }
  func.func @transform_4(%arg0: i32) -> (i32, i32) {
    %c0_i32 = arith.constant 0 : i32
    %c0_i32_0 = arith.constant 0 : i32
    %c0_i32_1 = arith.constant 0 : i32
    return %c0_i32, %c0_i32_0 : i32, i32
  }
  func.func @transform_5(%arg0: i32) -> (i32, i32) {
    %c0_i32 = arith.constant 0 : i32
    %c0_i32_0 = arith.constant 0 : i32
    %c0_i32_1 = arith.constant 0 : i32
    return %c0_i32, %c0_i32_0 : i32, i32
  }
  func.func @transform_6(%arg0: i32) -> (i32, i32) {
    %c0_i32 = arith.constant 0 : i32
    %c0_i32_0 = arith.constant 0 : i32
    %c0_i32_1 = arith.constant 0 : i32
    return %c0_i32, %c0_i32_0 : i32, i32
  }
  func.func @transform_7(%arg0: i32) -> (i32, i32) {
    %c0_i32 = arith.constant 0 : i32
    %c0_i32_0 = arith.constant 0 : i32
    %c0_i32_1 = arith.constant 0 : i32
    return %c0_i32, %c0_i32_0 : i32, i32
  }
  func.func @transform_8(%arg0: i32) -> (i32, i32) {
    %c0_i32 = arith.constant 0 : i32
    %c0_i32_0 = arith.constant 0 : i32
    %c0_i32_1 = arith.constant 0 : i32
    return %c0_i32, %c0_i32_0 : i32, i32
  }
  func.func @transform_9(%arg0: i32) -> (i32, i32) {
    %c0_i32 = arith.constant 0 : i32
    %c0_i32_0 = arith.constant 0 : i32
    return %arg0, %c0_i32 : i32, i32
  }
}

</mosaic_0001>

<bundles_post_ra>
// kernel: tpu_custom_call.1
= control target key start
LH: loop header
LB: loop body
LE: loop exit
PB: predicated region body
PF: predicated region fallthrough
CT: control target
= control target key end

     0   :  { %s2640_s0 = inlined_call_operand.hbm [shape: bf16[16,128], index: 0, kind: input, shape index: {}]   ;;  %s2641_s1 = inlined_call_operand.hbm [shape: bf16[128,48], index: 1, kind: input, shape index: {}]   ;;  %s2642_s2 = inlined_call_operand.hbm [shape: bf16[128,48], index: 2, kind: input, shape index: {}]   ;;  %s2643_s3 = inlined_call_operand.hbm [shape: bf16[128,48], index: 3, kind: input, shape index: {}]   ;;  %s2644_s4 = inlined_call_operand.hbm [shape: f32[1,48], index: 4, kind: input, shape index: {}]   ;;  %s2645_s5 = inlined_call_operand.hbm [shape: f32[1,48], index: 5, kind: input, shape index: {}]   ;;  %s2646_s6 = inlined_call_operand.hbm [shape: f32[1,48], index: 6, kind: input, shape index: {}]   ;;  %s2647_s7 = inlined_call_operand.hbm [shape: bf16[48,128], index: 7, kind: input, shape index: {}]   ;;  %s2648_s8 = inlined_call_operand.hbm [shape: f32[1,128], index: 8, kind: input, shape index: {}]   ;;  %s2649_s9 = inlined_call_operand.hbm [shape: f32[16,128], index: 9, kind: output, shape index: {}]  }
   0x1   :  { %2656 = sst [smem:[#allocation24_spill]] %s2641_s1 }
   0x2   :  { %2657 = sst [smem:[#allocation25_spill]] %s2649_s9 }
   0x3   :  { %14 = vsyncpa [#allocation3], 0 }
   0x4   :  { %16 = vsyncpa [#allocation3 + $0x1], 0 }
   0x5   :  { %17 = vsyncpa [#allocation6], 0 }
   0x6   :  { %18 = vsyncpa [#allocation9], 0 }
   0x7   :  { %19 = vsyncpa [#allocation12], 0 }
   0x8   :  { %20 = vsyncpa [#allocation15], 0 }
   0x9   :  { %21 = vsyncpa [#allocation4], 0 }
   0xa   :  { %23 = vsyncpa [#allocation4 + $0x1], 0  ;;  %s2167_s30 = smov 0   ;;  %s2169_s10 = smov 0  }
   0xb   :  { %s2171_s11 = smov 0   ;;  %s2173_s12 = smov 0  }
   0xc LB: > { %s2099_s13 = smov [#allocation5]   ;;  %s2188_s15 = sadd.s32 4294967295, %s2097_s12   ;;  %s2097_s12 = sphi %s2173_s12, %s2685_s12   ;;  %s2093_s11 = sphi %s2171_s11, %s2684_s11   ;;  %s2089_s10 = sphi %s2169_s10, %s2683_s10   ;;  %s2085_s30 = sphi %s2167_s30, %s2682_s30  }
   0xd   : > { %s266_s14 = sshll.u32 %s2099_s13, 4  ;;  %p1373_p0 = scmp.ge.s32.totalorder %s2097_s12, 1  ;;  %s2193_s14 = int_to_ptr.vmem [resolvable:$true] %s266_s14 }
   0xe   : > { %p2653_p1 = scmp.eq.s32.totalorder %s2188_s15, 0  ;;  %p254_p2 = scmp.lt.s32.totalorder %s2097_s12, 3 }
   0xf   : > { %s2100_s17 = smov [#allocation8]   ;;  %s2101_s20 = smov [#allocation11]  }
  0x10   : > { %p2195_p3 = pnand %p1373_p0, %p254_p2  ;;  %s292_s18 = sshll.u32 %s2100_s17, 4  ;;  %s2208_s18 = int_to_ptr.vmem [resolvable:$true] %s292_s18 }
  0x11   : > { %s317_s21 = sshll.u32 %s2101_s20, 4  ;;  %s2660_s1 = sld [smem:[#allocation24_spill]]  ;;  %s2210_s21 = int_to_ptr.vmem [resolvable:$true] %s317_s21 }
  0x12   : > { %s2658_s16 = scalar_select %p2195_p3, 1, 0 }
  0x13   : > { %p1623_p5 = pneg %p2195_p3 }
  0x15   : > { %p2204_p6 = pnand %p1623_p5, %p2653_p1 }
  0x17   : > { %s1761_s24 = scalar_lea.hbm %s2660_s1, 1024  ;;  %p2220_p8 = pneg %p2204_p6 }
  0x18   : > { %p1762_p7 = scmp.ne.s32.totalorder %s2660_s1, %s1761_s24  ;;  %p1768_p11 = scmp.lt.u32.totalorder %s1761_s24, %s2660_s1 }
  0x1a   : > { %p1764_p9 = pnand %p2220_p8, %p1762_p7 }
  0x1c   : > { %p1765_p10 = pneg %p1764_p9 }
  0x1e   : > { %p1770_p12 = pnand %p1768_p11, %p1765_p10 }
  0x20   : > { %1773 = shalt.err (!%p1770_p12)
}
  0x21   : > { %s1774_s13 = scalar_lea.vmem %s2193_s14, 1024  ;;  %p1782_p5 = scmp.lt.s32.totalorder %s2193_s14, %s2193_s14 }
  0x22   : > { %p1775_p13 = scmp.ne.s32.totalorder %s2193_s14, %s1774_s13  ;;  %p1783_p4 = scmp.lt.s32.totalorder %s1774_s13, %s1774_s13 }
  0x24   : > { %p1777_p0 = pnand %p1775_p13, %p2220_p8  ;;  %p1784_p7 = por %p1783_p4, %p1782_p5 }
  0x26   : > { %p1778_p2 = pneg %p1777_p0 }
  0x28   : > { %p1785_p9 = pnand %p1784_p7, %p1778_p2 }
  0x2a   : > { %1788 = shalt.err (!%p1785_p9)
}
  0x2b   : > { %s2651_s17 = smov 64   ;;  %s2103_s20 = smov 4  }
  0x2c   : > { %1626 = dma.hbm_to_vmem [thread:$0]  (!%p2204_p6), %s2660_s1, 1024, %s2193_s14, [#allocation6], %s2651_s17, %s2651_s17, %s2103_s20  }
  0x2d   : > { %s1789_s26 = scalar_lea.hbm %s2643_s3, 1024 }
  0x2e   : > { %p1790_p4 = scmp.ne.s32.totalorder %s2643_s3, %s1789_s26  ;;  %p1796_p12 = scmp.lt.u32.totalorder %s1789_s26, %s2643_s3 }
  0x30   : > { %p1792_p10 = pnand %p1790_p4, %p2220_p8 }
  0x32   : > { %p1793_p11 = pneg %p1792_p10 }
  0x34   : > { %p1798_p13 = pnand %p1796_p12, %p1793_p11 }
  0x36   : > { %1801 = shalt.err (!%p1798_p13)
}
  0x37   : > { %s1802_s14 = scalar_lea.vmem %s2208_s18, 1024  ;;  %p1810_p7 = scmp.lt.s32.totalorder %s2208_s18, %s2208_s18 }
  0x38   : > { %p1803_p0 = scmp.ne.s32.totalorder %s2208_s18, %s1802_s14  ;;  %p1811_p9 = scmp.lt.s32.totalorder %s1802_s14, %s1802_s14 }
  0x3a   : > { %p1805_p2 = pnand %p1803_p0, %p2220_p8  ;;  %p1812_p4 = por %p1811_p9, %p1810_p7 }
  0x3c   : > { %p1806_p5 = pneg %p1805_p2 }
  0x3e   : > { %p1813_p10 = pnand %p1812_p4, %p1806_p5 }
  0x40   : > { %1816 = shalt.err (!%p1813_p10)
}
  0x41   : > { %1632 = dma.hbm_to_vmem [thread:$0]  (!%p2204_p6), %s2643_s3, 1024, %s2208_s18, [#allocation9], %s2651_s17, %s2651_s17, %s2103_s20  }
  0x42   : > { %s1817_s25 = scalar_lea.hbm %s2645_s5, 16 }
  0x43   : > { %p1818_p11 = scmp.ne.s32.totalorder %s2645_s5, %s1817_s25  ;;  %p1824_p0 = scmp.lt.u32.totalorder %s1817_s25, %s2645_s5 }
  0x45   : > { %p1820_p12 = pnand %p1818_p11, %p2220_p8 }
  0x47   : > { %p1821_p13 = pneg %p1820_p12 }
  0x49   : > { %p1826_p2 = pnand %p1824_p0, %p1821_p13 }
  0x4b   : > { %1829 = shalt.err (!%p1826_p2)
}
  0x4c   : > { %s1830_s18 = scalar_lea.vmem %s2210_s21, 16  ;;  %s1837_s14 = scalar_lea.vmem %s2210_s21, 32 }
  0x4d   : > { %p1831_p5 = scmp.ne.s32.totalorder %s2210_s21, %s1830_s18  ;;  %p1838_p4 = scmp.lt.s32.totalorder %s2210_s21, %s2210_s21 }
  0x4e   : > { %p1839_p10 = scmp.lt.s32.totalorder %s1837_s14, %s1830_s18 }
  0x4f   : > { %p1833_p7 = pnand %p1831_p5, %p2220_p8 }
  0x50   : > { %p1840_p11 = por %p1839_p10, %p1838_p4 }
  0x51   : > { %p1834_p9 = pneg %p1833_p7 }
  0x53   : > { %p1841_p12 = pnand %p1840_p11, %p1834_p9 }
  0x55   : > { %1844 = shalt.err (!%p1841_p12)
}
  0x56   : > { %1638 = dma.hbm_to_vmem [thread:$0]  (!%p2204_p6), %s2645_s5, 16, %s2210_s21, [#allocation12]  }
  0x57   : > { %s2104_s23 = smov [#allocation14]   ;;  %s2105_s25 = smov [#allocation7]  }
  0x58   : > { %s338_s24 = sshll.u32 %s2104_s23, 4  ;;  %s279_s26 = sshll.u32 %s2105_s25, 4  ;;  %s339_s24 = int_to_ptr.vmem [resolvable:$true] %s338_s24  ;;  %s280_s26 = int_to_ptr.vmem [resolvable:$true] %s279_s26 }
  0x59   : > { %s1845_s13 = scalar_lea.hbm %s2647_s7, 384 }
  0x5a   : > { %p1846_p13 = scmp.ne.s32.totalorder %s2647_s7, %s1845_s13  ;;  %p1852_p5 = scmp.lt.u32.totalorder %s1845_s13, %s2647_s7 }
  0x5c   : > { %p1848_p0 = pnand %p1846_p13, %p2220_p8 }
  0x5e   : > { %p1849_p2 = pneg %p1848_p0 }
  0x60   : > { %p1854_p7 = pnand %p1852_p5, %p1849_p2 }
  0x62   : > { %1857 = shalt.err (!%p1854_p7)
}
  0x63   : > { %s1858_s21 = scalar_lea.vmem %s339_s24, 384  ;;  %p1866_p11 = scmp.lt.s32.totalorder %s339_s24, %s339_s24 }
  0x64   : > { %p1859_p9 = scmp.ne.s32.totalorder %s339_s24, %s1858_s21  ;;  %p1867_p12 = scmp.lt.s32.totalorder %s1858_s21, %s1858_s21 }
  0x66   : > { %p1861_p4 = pnand %p1859_p9, %p2220_p8  ;;  %p1868_p1 = por %p1867_p12, %p1866_p11 }
  0x68   : > { %p1862_p10 = pneg %p1861_p4 }
  0x6a   : > { %p1869_p3 = pnand %p1868_p1, %p1862_p10 }
  0x6c   : > { %1872 = shalt.err (!%p1869_p3)
}
  0x6d   : > { %s2662_s22 = smov 64   ;;  %s1873_s29 = scalar_lea.hbm %s2642_s2, 1024 }
  0x6e   : > { %1644 = dma.hbm_to_vmem [thread:$0]  (!%p2204_p6), %s2647_s7, 384, %s339_s24, [#allocation15], %s2662_s22, %s2662_s22, %s2103_s20  }
  0x6f   : > { %p1874_p1 = scmp.ne.s32.totalorder %s2642_s2, %s1873_s29  ;;  %p1880_p0 = scmp.lt.u32.totalorder %s1873_s29, %s2642_s2 }
  0x71   : > { %p1876_p3 = pnand %p1874_p1, %p2220_p8 }
  0x73   : > { %p1877_p13 = pneg %p1876_p3 }
  0x75   : > { %p1882_p2 = pnand %p1880_p0, %p1877_p13 }
  0x77   : > { %1885 = shalt.err (!%p1882_p2)
}
  0x78   : > { %s1886_s21 = scalar_lea.vmem %s280_s26, 1024  ;;  %p1894_p4 = scmp.lt.s32.totalorder %s280_s26, %s280_s26 }
  0x79   : > { %p1887_p5 = scmp.ne.s32.totalorder %s280_s26, %s1886_s21  ;;  %p1895_p10 = scmp.lt.s32.totalorder %s1886_s21, %s1886_s21 }
  0x7b   : > { %p1889_p7 = pnand %p1887_p5, %p2220_p8  ;;  %p1896_p11 = por %p1895_p10, %p1894_p4 }
  0x7d   : > { %p1890_p9 = pneg %p1889_p7 }
  0x7f   : > { %p1897_p12 = pnand %p1896_p11, %p1890_p9 }
  0x81   : > { %1900 = shalt.err (!%p1897_p12)
}
  0x82   : > { %1629 = dma.hbm_to_vmem [thread:$0]  (!%p2204_p6), %s2642_s2, 1024, %s280_s26, [#allocation6], %s2662_s22, %s2662_s22, %s2103_s20  }
  0x83   : > { %s2106_s23 = smov [#allocation10]   ;;  %s2107_s28 = smov [#allocation13]  }
  0x84   : > { %s306_s25 = sshll.u32 %s2106_s23, 4  ;;  %s328_s29 = sshll.u32 %s2107_s28, 4  ;;  %s307_s25 = int_to_ptr.vmem [resolvable:$true] %s306_s25  ;;  %s329_s29 = int_to_ptr.vmem [resolvable:$true] %s328_s29 }
  0x85   : > { %s1901_s14 = scalar_lea.hbm %s2644_s4, 16 }
  0x86   : > { %p1902_p1 = scmp.ne.s32.totalorder %s2644_s4, %s1901_s14  ;;  %p1908_p0 = scmp.lt.u32.totalorder %s1901_s14, %s2644_s4 }
  0x88   : > { %p1904_p3 = pnand %p1902_p1, %p2220_p8 }
  0x8a   : > { %p1905_p13 = pneg %p1904_p3 }
  0x8c   : > { %p1910_p2 = pnand %p1908_p0, %p1905_p13 }
  0x8e   : > { %1913 = shalt.err (!%p1910_p2)
}
  0x8f   : > { %s1914_s20 = scalar_lea.vmem %s307_s25, 16  ;;  %s1921_s26 = scalar_lea.vmem %s307_s25, 32 }
  0x90   : > { %p1915_p5 = scmp.ne.s32.totalorder %s307_s25, %s1914_s20  ;;  %p1922_p4 = scmp.lt.s32.totalorder %s307_s25, %s307_s25 }
  0x91   : > { %p1923_p10 = scmp.lt.s32.totalorder %s1921_s26, %s1914_s20 }
  0x92   : > { %p1917_p7 = pnand %p1915_p5, %p2220_p8 }
  0x93   : > { %p1924_p11 = por %p1923_p10, %p1922_p4 }
  0x94   : > { %p1918_p9 = pneg %p1917_p7 }
  0x96   : > { %p1925_p12 = pnand %p1924_p11, %p1918_p9 }
  0x98   : > { %1928 = shalt.err (!%p1925_p12)
}
  0x99   : > { %1635 = dma.hbm_to_vmem [thread:$0]  (!%p2204_p6), %s2644_s4, 16, %s307_s25, [#allocation9]  }
  0x9a   : > { %s1929_s28 = scalar_lea.hbm %s2646_s6, 16 }
  0x9b   : > { %p1930_p1 = scmp.ne.s32.totalorder %s2646_s6, %s1929_s28  ;;  %p1936_p0 = scmp.lt.u32.totalorder %s1929_s28, %s2646_s6 }
  0x9d   : > { %p1932_p3 = pnand %p1930_p1, %p2220_p8 }
  0x9f   : > { %p1933_p13 = pneg %p1932_p3 }
  0xa1   : > { %p1938_p2 = pnand %p1936_p0, %p1933_p13 }
  0xa3   : > { %1941 = shalt.err (!%p1938_p2)
}
  0xa4   : > { %s1942_s21 = scalar_lea.vmem %s329_s29, 16  ;;  %s1949_s25 = scalar_lea.vmem %s329_s29, 32 }
  0xa5   : > { %p1943_p5 = scmp.ne.s32.totalorder %s329_s29, %s1942_s21  ;;  %p1950_p4 = scmp.lt.s32.totalorder %s329_s29, %s329_s29 }
  0xa6   : > { %p1951_p10 = scmp.lt.s32.totalorder %s1949_s25, %s1942_s21 }
  0xa7   : > { %p1945_p7 = pnand %p1943_p5, %p2220_p8 }
  0xa8   : > { %p1952_p11 = por %p1951_p10, %p1950_p4 }
  0xa9   : > { %p1946_p9 = pneg %p1945_p7 }
  0xab   : > { %p1953_p12 = pnand %p1952_p11, %p1946_p9 }
  0xad   : > { %1956 = shalt.err (!%p1953_p12)
}
  0xae   : > { %1641 = dma.hbm_to_vmem [thread:$0]  (!%p2204_p6), %s2646_s6, 16, %s329_s29, [#allocation12]  }
  0xaf   : > { %s2108_s26 = smov [#allocation16]   ;;  %s1957_s23 = scalar_lea.hbm %s2648_s8, 16 }
  0xb0   : > { %s352_s22 = sshll.u32 %s2108_s26, 4  ;;  %p1958_p1 = scmp.ne.s32.totalorder %s2648_s8, %s1957_s23  ;;  %s353_s22 = int_to_ptr.vmem [resolvable:$true] %s352_s22 }
  0xb1   : > { %p1964_p0 = scmp.lt.u32.totalorder %s1957_s23, %s2648_s8 }
  0xb2   : > { %p1960_p3 = pnand %p1958_p1, %p2220_p8 }
  0xb4   : > { %p1961_p13 = pneg %p1960_p3 }
  0xb6   : > { %p1966_p2 = pnand %p1964_p0, %p1961_p13 }
  0xb8   : > { %1969 = shalt.err (!%p1966_p2)
}
  0xb9   : > { %s1970_s29 = scalar_lea.vmem %s353_s22, 16  ;;  %s1977_s9 = scalar_lea.vmem %s353_s22, 32 }
  0xba   : > { %p1971_p5 = scmp.ne.s32.totalorder %s353_s22, %s1970_s29  ;;  %p1978_p4 = scmp.lt.s32.totalorder %s353_s22, %s353_s22 }
  0xbb   : > { %p1979_p10 = scmp.lt.s32.totalorder %s1977_s9, %s1970_s29 }
  0xbc   : > { %p1973_p7 = pnand %p1971_p5, %p2220_p8 }
  0xbd   : > { %p1980_p11 = por %p1979_p10, %p1978_p4 }
  0xbe   : > { %p1974_p9 = pneg %p1973_p7 }
  0xc0   : > { %p1981_p12 = pnand %p1980_p11, %p1974_p9 }
  0xc2   : > { %1984 = shalt.err (!%p1981_p12)
}
  0xc3   : > { %1647 = dma.hbm_to_vmem [thread:$0]  (!%p2204_p6), %s2648_s8, 16, %s353_s22, [#allocation15]  }
  0xc4   : > { %s1372_s27 = sadd.s32 4294967294, %s2097_s12   ;;  %s2392_s19 = sadd.s32 1, %s2097_s12  }
  0xc5   : > { %s33_s24 = ssub.s32 %s2097_s12, %s2392_s19  ;;  %s36_s20 = sadd.s32 1, %s2093_s11 }
  0xc6   : > { %p34_p8 = scmp.eq.s32.totalorder %s33_s24, 0  ;;  %p43_p1 = scmp.ne.s32.totalorder %s2093_s11, %s2089_s10 }
  0xc7   : > { %p44_p3 = scmp.eq.s32.totalorder %s2097_s12, 0  ;;  %p49_p13 = scmp.ne.s32.totalorder %s2089_s10, %s2085_s30 }
  0xc8   : > { %s2403_s26 = scalar_select %p34_p8, %s2093_s11, %s36_s20  }
  0xc9   : > { %p2405_p0 = por %p44_p3, %p43_p1  ;;  %p2664_p2 = scmp.eq.s32.totalorder %s2188_s15, 0 }
  0xca   : > { %p241_p5 = scmp.eq.s32.totalorder %s2188_s15, 1  ;;  %p247_p7 = scmp.eq.s32.totalorder %s1372_s27, 1 }
  0xcb   : > { %p2411_p6 = por %p2664_p2, %p49_p13  ;;  %p1664_p9 = scmp.lt.s32.totalorder %s2097_s12, 2 }
  0xcc   : > { %s363_s1 = sand.u32 1, %s2093_s11   ;;  %p2418_p4 = por %p241_p5, %p43_p1 }
  0xcd   : > { %p2422_p10 = por %p247_p7, %p49_p13  ;;  %s1383_s13 = sshll.u32 %s363_s1, 2 }
  0xce   : > { %s2666_s23 = scalar_select %p2418_p4, 1, 0 }
  0xcf   : > { %s2667_s28 = scalar_select %p2422_p10, 1, 0 }
  0xd0   : > { %s1384_s18 = sshll.u32 %s2097_s12, 6  ;;  %s367_s21 = scalar_lea.vmem [#allocation2], %s1383_s13 }
  0xd1   : > { %s2430_s9 = scalar_lea.hbm %s2640_s0, %s1384_s18  ;;  %s374_s25 = sshll.u32 %s367_s21, 4  ;;  %s2432_s25 = int_to_ptr.vmem [resolvable:$true] %s374_s25 }
  0xd2   : > { %p2436_p11 = pnand %p1664_p9, %p2405_p0  ;;  %s364_s24 = scalar_lea.sflag [#allocation3], %s363_s1 }
  0xd3   : > { %s1985_s20 = scalar_lea.hbm %s2430_s9, 64  ;;  %s1990_s14 = scalar_lea.hbm %s2640_s0, 128 }
  0xd4   : > { %p1986_p12 = scmp.ne.s32.totalorder %s2430_s9, %s1985_s20  ;;  %p1987_p8 = pneg %p2436_p11 }
  0xd5   : > { %p1991_p13 = scmp.lt.u32.totalorder %s2430_s9, %s2640_s0  ;;  %p1992_p0 = scmp.lt.u32.totalorder %s1990_s14, %s1985_s20 }
  0xd6   : > { %p1988_p1 = pnand %p1987_p8, %p1986_p12  ;;  %p1994_p5 = scmp.lt.u32.totalorder %s1985_s20, %s2430_s9 }
  0xd7   : > { %p1993_p2 = por %p1992_p0, %p1991_p13 }
  0xd8   : > { %p1989_p3 = pneg %p1988_p1 }
  0xd9   : > { %p1995_p7 = por %p1994_p5, %p1993_p2 }
  0xdb   : > { %p1996_p9 = pnand %p1995_p7, %p1989_p3 }
  0xdd   : > { %1999 = shalt.err (!%p1996_p9)
}
  0xde   : > { %s2000_s1 = scalar_lea.vmem %s2432_s25, 64  ;;  %s2109_s21 = smov [#allocation2]  }
  0xdf   : > { %p2001_p12 = scmp.ne.s32.totalorder %s2432_s25, %s2000_s1  ;;  %s2005_s13 = sshll.u32 %s2109_s21, 4  ;;  %s2006_s13 = int_to_ptr.vmem [resolvable:$false] %s2005_s13 }
  0xe0   : > { %s2007_s18 = scalar_lea.vmem %s2006_s13, 128  ;;  %p2008_p4 = scmp.lt.s32.totalorder %s2432_s25, %s2006_s13 }
  0xe1   : > { %p2003_p1 = pnand %p2001_p12, %p1987_p8  ;;  %p2009_p13 = scmp.lt.s32.totalorder %s2007_s18, %s2000_s1 }
  0xe3   : > { %p2004_p10 = pneg %p2003_p1  ;;  %p2010_p0 = por %p2009_p13, %p2008_p4 }
  0xe5   : > { %p2011_p2 = pnand %p2010_p0, %p2004_p10 }
  0xe7   : > { %2014 = shalt.err (!%p2011_p2)
}
  0xe8   : > { %1651 = dma.hbm_to_vmem [thread:$0]  (!%p2436_p11), %s2430_s9, 64, %s2432_s25, %s364_s24  }
  0xe9   : > { %p2669_p3 = scmp.ne.s32.totalorder %s2658_s16, 0 }
  0xea   : > { %s2468_s20 = sand.u32 (!%p2669_p3), 1, %s2089_s10  }
  0xeb   : > { %383 = sbr.rel (%p2669_p3) target bundleno = 2671 (0xa6f), region = 56  ;;  %s1386_s14 = sshll.u32 (!%p2669_p3), %s2468_s20, 2 }
  0xec   : > { %s386_s17 = scalar_lea.sflag (!%p2669_p3), [#allocation3], %s2468_s20  ;;  %s2472_s29 = scalar_lea.vmem (!%p2669_p3), [#allocation2], %s1386_s14 }
  0xf2   : > { %2060 = dma.done.wait (%p2411_p6), %s386_s17, 64  }
  0xf3   : > { %2062 = vsyncadd (%p2411_p6), %s386_s17, 4294967232  ;;  %p2670_p4 = scmp.eq.s32.totalorder %s2188_s15, 0 }
  0xf5   : > { %2064 = dma.done.wait (%p2670_p4), [#allocation6], 2048   ;;  %p2671_p10 = pmov %p2670_p4 }
  0xf6   : > { %p2672_p11 = pmov %p2670_p4 }
  0xf7   : > { %2066 = vsyncadd (%p2671_p10), [#allocation6], 4294965248 }
  0xf8   : > { %2068 = dma.done.wait (%p2672_p11), [#allocation9], 1040   ;;  %p2673_p8 = pmov %p2670_p4 }
  0xf9   : > { %p2674_p5 = pmov %p2670_p4 }
  0xfa   : > { %2070 = vsyncadd (%p2673_p8), [#allocation9], 4294966256 }
  0xfb   : > { %2072 = dma.done.wait (%p2674_p5), [#allocation12], 32   ;;  %p2675_p7 = pmov %p2670_p4 }
  0xfc   : > { %p2676_p6 = pmov %p2670_p4 }
  0xfd   : > { %2074 = vsyncadd (%p2675_p7), [#allocation12], 4294967264 }
  0xfe   : > { %2076 = dma.done.wait (%p2676_p6), [#allocation15], 400   ;;  %p2677_p9 = pmov %p2670_p4 }
  0xff   : > { %v2110_v0 = vmov 0.0   ;;  %vm2111_vm0 = vmmov 0   ;;  %v1722_v1 = vld [vmem:[#allocation7] sm:$0xff]   ;;  %v1723_v2 = vld [vmem:[#allocation7 + $0x8] sm:$0xff]   ;;  %v1725_v5 = vld [vmem:[#allocation7 + $0x10] sm:$0xff]   ;;  %vm794_vm1 = vcmask 130048  }
 0x100   : > { %2078 = vsyncadd (%p2677_p9), [#allocation15], 4294966896  ;;  %1501 = vmatprep.subr.bf16.mxu1 %v2110_v0  ;;  %1481 = vmatprep.subr.bf16.mxu0 %v2110_v0  ;;  %v1724_v3 = vld [vmem:[#allocation5] sm:$0xff]   ;;  %v1726_v4 = vld [vmem:[#allocation5 + $0x8] sm:$0xff]   ;;  %s2112_s16 = smov 112   ;;  %vm841_vm2 = vcmask 64512  }
 0x101   : > { %1517 = vmatprep.mubr.msk.bf16.mxu1 %vm2111_vm0, %v2110_v0  ;;  %1497 = vmatprep.mubr.msk.bf16.mxu0 %vm2111_vm0, %v2110_v0  ;;  %v1728_v6 = vld [vmem:[#allocation5 + $0x10] sm:$0xff]   ;;  %v1727_v7 = vld [vmem:[#allocation7 + $0x18] sm:$0xff]   ;;  %v1729_v9 = vld [vmem:[#allocation7 + $0x20] sm:$0xff]   ;;  %vm857_vm3 = vcmask 1043456   ;;  %s2113_s22 = smov 96   ;;  %s2114_s9 = smov 16  }
 0x102   : > { %1502 = vmatpush3.bf16.msra.mxu1 %v1722_v1  ;;  %1482 = vmatpush3.bf16.msra.mxu0 %v1724_v3  ;;  %v1730_v8 = vld [vmem:[#allocation5 + $0x18] sm:$0xff]   ;;  %v1731_v10 = vld [vmem:[#allocation7 + $0x28] sm:$0xff]   ;;  %v1732_v11 = vld [vmem:[#allocation5 + $0x20] sm:$0xff]   ;;  %s2115_s25 = smov 32   ;;  %vm1133_vm4 = vcmask 261120   ;;  %vm1167_vm5 = vcmask 392192  }
 0x103   : > { %1503 = vmatprep.subr.bf16.mxu1 %v2110_v0  ;;  %1483 = vmatprep.subr.bf16.mxu0 %v2110_v0  ;;  %v1734_v12 = vld [vmem:[#allocation5 + $0x28] sm:$0xff]   ;;  %v1733_v13 = vld [vmem:[#allocation7 + $0x30] sm:$0xff]   ;;  %v1735_v15 = vld [vmem:[#allocation7 + $0x38] sm:$0xff]   ;;  %s1395_s27 = sshll.u32 %s2468_s20, 3  ;;  %s1435_s24 = sshll.u32 %s2188_s15, 7 }
 0x104   : > { %v1736_v14 = vld [vmem:[#allocation5 + $0x30] sm:$0xff]   ;;  %v1737_v16 = vld [vmem:[#allocation5 + $0x38] sm:$0xff]   ;;  %v1405_v18 = vld [vmem:[#allocation11] ss:$0 sm:$0xff]  ;;  %s455_s1 = scalar_lea.vmem [#allocation17], %s1395_s27  ;;  %s2678_s14 = sld [smem:[#allocation25_spill]] }
 0x105   : > { %v457_v17 = vld [vmem:[%s2472_s29] sm:$0xf]  ;;  %v1396_v20 = vld [vmem:[#allocation10] ss:$0 sm:$0xff]  ;;  %v1739_v34 = vld [vmem:[#allocation8 + $0x8] sm:$0xff]   ;;  %s1226_s21 = sshll.u32 %s455_s1, 4  ;;  %s2598_s21 = int_to_ptr.vmem [resolvable:$true] %s1226_s21 }
 0x106   : > { %1504 = vmatpush3.bf16.msra.mxu1 %v1723_v2  ;;  %1484 = vmatpush3.bf16.msra.mxu0 %v1726_v4  ;;  %v1738_v33 = vld [vmem:[#allocation8] sm:$0xff]   ;;  %v1740_v35 = vld [vmem:[#allocation8 + $0x10] sm:$0xff]   ;;  %v1741_v36 = vld [vmem:[#allocation8 + $0x18] sm:$0xff]   ;;  %s1213_s29 = scalar_lea.sflag [#allocation4], %s2468_s20  ;;  %s2015_s15 = scalar_lea.vmem %s2598_s21, 128 }
 0x107   : > { %1505 = vmatprep.subr.bf16.mxu1 %v2110_v0  ;;  %1485 = vmatprep.subr.bf16.mxu0 %v2110_v0  ;;  %v1742_v37 = vld [vmem:[#allocation8 + $0x20] sm:$0xff]   ;;  %v1743_v38 = vld [vmem:[#allocation8 + $0x28] sm:$0xff]   ;;  %v1744_v39 = vld [vmem:[#allocation8 + $0x30] sm:$0xff]   ;;  %p2016_p12 = scmp.ne.s32.totalorder %s2598_s21, %s2015_s15  ;;  %p2679_p1 = scmp.ne.s32.totalorder %s2666_s23, 0 }
 0x108   : > { %v1745_v40 = vld [vmem:[#allocation8 + $0x38] sm:$0xff]   ;;  %v1414_v55 = vld [vmem:[#allocation13] ss:$0 sm:$0xff] }
 0x109   : > { %p2017_p13 = pnand %p2016_p12, %p2679_p1 }
 0x10a   : > { %1506 = vmatpush3.bf16.msra.mxu1 %v1725_v5  ;;  %1486 = vmatpush3.bf16.msra.mxu0 %v1728_v6  ;;  %s2596_s17 = scalar_lea.hbm %s2678_s14, %s1435_s24 }
 0x10b   : > { %1507 = vmatprep.subr.bf16.mxu1 %v2110_v0  ;;  %1487 = vmatprep.subr.bf16.mxu0 %v2110_v0  ;;  %p2018_p0 = pneg %p2017_p13 }
 0x10e   : > { %1508 = vmatpush3.bf16.msra.mxu1 %v1727_v7  ;;  %1488 = vmatpush3.bf16.msra.mxu0 %v1730_v8 }
 0x10f   : > { %1509 = vmatprep.subr.bf16.mxu1 %v2110_v0  ;;  %1489 = vmatprep.subr.bf16.mxu0 %v2110_v0 }
 0x112   : > { %1510 = vmatpush3.bf16.msra.mxu1 %v1729_v9  ;;  %1490 = vmatpush3.bf16.msra.mxu0 %v1732_v11 }
 0x113   : > { %1511 = vmatprep.subr.bf16.mxu1 %v2110_v0  ;;  %1491 = vmatprep.subr.bf16.mxu0 %v2110_v0 }
 0x116   : > { %1512 = vmatpush3.bf16.msra.mxu1 %v1731_v10  ;;  %1492 = vmatpush3.bf16.msra.mxu0 %v1734_v12 }
 0x117   : > { %1513 = vmatprep.subr.bf16.mxu1 %v2110_v0  ;;  %1493 = vmatprep.subr.bf16.mxu0 %v2110_v0 }
 0x11a   : > { %1514 = vmatpush3.bf16.msra.mxu1 %v1733_v13  ;;  %1494 = vmatpush3.bf16.msra.mxu0 %v1736_v14 }
 0x11b   : > { %1515 = vmatprep.subr.bf16.mxu1 %v2110_v0  ;;  %1495 = vmatprep.subr.bf16.mxu0 %v2110_v0 }
 0x11e   : > { %1516 = vmatpush3.bf16.msra.mxu1 %v1735_v15  ;;  %1496 = vmatpush3.bf16.msra.mxu0 %v1737_v16 }
 0x11f   : > { %1541 = vmatprep.subr.bf16.mxu1 %v2110_v0  ;;  %1521 = vmatprep.subr.bf16.mxu0 %v2110_v0 }
 0x121   : > { %1518 = vmatmul.mubr.bf16.vlgmr.msra.gmra.mrb[0].mxu1 %v457_v17  ;;  %1498 = vmatmul.mubr.bf16.vlgmr.msra.gmra.mrb[0].mxu0 %v457_v17 }
 0x122   : > { %1543 = vmatprep.mubr.msk.bf16.mxu1 %vm2111_vm0, %v2110_v0  ;;  %1537 = vmatprep.mubr.msk.bf16.mxu0 %vm2111_vm0, %v2110_v0 }
 0x123   : > { %1522 = vmatpush3.bf16.msra.mxu0 %v1738_v33 }
 0x124   : > { %1523 = vmatprep.subr.bf16.mxu0 %v2110_v0 }
 0x127   : > { %1524 = vmatpush3.bf16.msra.mxu0 %v1739_v34 }
 0x128   : > { %1525 = vmatprep.subr.bf16.mxu0 %v2110_v0 }
 0x12b   : > { %1526 = vmatpush3.bf16.msra.mxu0 %v1740_v35 }
 0x12c   : > { %1527 = vmatprep.subr.bf16.mxu0 %v2110_v0 }
 0x12f   : > { %1528 = vmatpush3.bf16.msra.mxu0 %v1741_v36 }
 0x130   : > { %1529 = vmatprep.subr.bf16.mxu0 %v2110_v0 }
 0x133   : > { %1530 = vmatpush3.bf16.msra.mxu0 %v1742_v37 }
 0x134   : > { %1531 = vmatprep.subr.bf16.mxu0 %v2110_v0 }
 0x137   : > { %1532 = vmatpush3.bf16.msra.mxu0 %v1743_v38 }
 0x138   : > { %1533 = vmatprep.subr.bf16.mxu0 %v2110_v0 }
 0x13b   : > { %1534 = vmatpush3.bf16.msra.mxu0 %v1744_v39 }
 0x13c   : > { %1535 = vmatprep.subr.bf16.mxu0 %v2110_v0 }
 0x13f   : > { %1536 = vmatpush3.bf16.msra.mxu0 %v1745_v40 }
 0x140   : > { %1577 = vmatprep.subr.bf16.mxu0 %v2110_v0 }
 0x142   : > { %1538 = vmatmul.mubr.bf16.vlgmr.msra.gmra.mrb[4].mxu0 %v457_v17 }
 0x143   : > { %1583 = vmatprep.mubr.msk.bf16.mxu0 %vm2111_vm0, %v2110_v0 }
 0x1f4   : > { %v674_v19 = vpop.f32.mrb[0].mxu1  ;;  %v563_v24 = vpop.f32.mrb[0].mxu0 }
 0x1f5   : > { %v675_v21 = vadd.f32 %v1405_v18, %v674_v19  ;;  %v1519_v22 = vpop.f32.mrb[1].mxu1  ;;  %v564_v27 = vadd.f32 %v1396_v20, %v563_v24  ;;  %v1499_v28 = vpop.f32.mrb[1].mxu0 }
 0x1f6   : > { %v677_v23 = vpop.f32.mrb[2].mxu1  ;;  %v566_v29 = vpop.f32.mrb[2].mxu0 }
 0x1f7   : > { %v2521_v25 = vpack.c.bf16 %v675_v21, %v675_v21  ;;  %v1520_v26 = vpop.f32.mrb[3].mxu1  ;;  %v2525_v30 = vpack.c.bf16 %v564_v27, %v564_v27  ;;  %v1500_v32 = vpop.f32.mrb[3].mxu0 }
 0x1f9   : > { %905 = vrot.lane.b32.xlu1 %v2521_v25, %s2112_s16  ;;  %v799_v31 = vsel %vm794_vm1, %v2521_v25, 0 }
 0x1fa   : > { %1542 = vmatpush3.bf16.xpose.msra.mxu1 %v799_v31 }
 0x1fb   : > { %1547 = vmatprep.subr.bf16.mxu1 %v2110_v0 }
 0x1fd   : > { %902 = vrot.lane.b32.xlu1 %v2525_v30, %s2112_s16 }
 0x201   : > { %1544 = vmatmul.mubr.msk.bf16.vlgmr.msra.gmra.mrb[4].mxu1 %vm794_vm1, %v2525_v30 }
 0x202   : > { %1549 = vmatprep.mubr.msk.bf16.mxu1 %vm2111_vm0, %v2110_v0 }
 0x215   : > { %v785_v46 = vpop.f32.mrb[4].mxu0 }
 0x216   : > { %v1539_v47 = vpop.f32.mrb[5].mxu0  ;;  %v786_v56 = vadd.f32 %v1414_v55, %v785_v46  ;;  %v1746_v46 = vld [vmem:[#allocation14] sm:$0xff]  }
 0x217   : > { %v788_v48 = vpop.f32.mrb[6].mxu0  ;;  %1578 = vmatpush3.bf16.msra.mxu0 %v1746_v46  ;;  %v1747_v47 = vld [vmem:[#allocation14 + $0x8] sm:$0xff]  }
 0x218   : > { %v1540_v49 = vpop.f32.mrb[7].mxu0  ;;  %v2548_v57 = vpack.c.bf16 %v786_v56, %v786_v56  ;;  %1579 = vmatprep.subr.bf16.mxu0 %v2110_v0  ;;  %v1748_v48 = vld [vmem:[#allocation14 + $0x10] sm:$0xff]  }
 0x21a   : > { %v859_v58 = vsel %vm857_vm3, %v2548_v57, 0 }
 0x21b   : > { %1548 = vmatpush3.bf16.msra.mxu1 %v859_v58  ;;  %1580 = vmatpush3.bf16.msra.mxu0 %v1747_v47 }
 0x21c   : > { %1553 = vmatprep.subr.bf16.mxu1 %v2110_v0  ;;  %1581 = vmatprep.subr.bf16.mxu0 %v2110_v0 }
 0x21f   : > { %1582 = vmatpush3.bf16.msra.mxu0 %v1748_v48 }
 0x26b   : > { %v906_v62 = vpop.permute.xlu1 %905 }
 0x26c   : > { %v911_v1 = vsel %vm794_vm1, %v906_v62, 0 }
 0x26f   : > { %v903_v2 = vpop.permute.xlu1 %902 }
 0x2d4   : > { %v835_v41 = vpop.f32.mrb[4].mxu1 }
 0x2d5   : > { %v1545_v42 = vpop.f32.mrb[5].mxu1  ;;  %v842_v43 = vsel %vm841_vm2, %v835_v41, -inf }
 0x2d6   : > { %843 = vmax.xlane.f32.xlu0 %v842_v43  ;;  %v838_v44 = vpop.f32.mrb[6].mxu1 }
 0x2d7   : > { %v1546_v45 = vpop.f32.mrb[7].mxu1 }
 0x363   : > { %v844_v50 = vpop.xlane.xlu0 %843 }
 0x364   : > { %v845_v51 = vsub.f32 %v835_v41, %v844_v50 }
 0x366   : > { %v846_v52 = vmul.f32 1.442695, %v845_v51 }
 0x368   : > { %1749 = vpow2.f32 %v846_v52 }
 0x372   : > { %v1750_v53 = vpop.eup %1749 }
 0x373   : > { %v848_v54 = vsel %vm841_vm2, %v1750_v53, 0.0 }
 0x374   : > { %849 = vadd.xlane.f32.xlu0 %v848_v54 }
 0x401   : > { %v850_v59 = vpop.xlane.xlu0 %849 }
 0x402   : > { %1751 = vrcp.f32 %v850_v59 }
 0x40c   : > { %v1752_v60 = vpop.eup %1751 }
 0x40d   : > { %v852_v61 = vmul.f32 %v1752_v60, %v1750_v53 }
 0x40f   : > { %v853_v63 = vpack.c.bf16 %v852_v61, %v852_v61 }
 0x411   : > { %1550 = vmatmul.mubr.msk.bf16.vlgmr.msra.gmra.mrb[8].mxu1 %vm841_vm2, %v853_v63 }
 0x412   : > { %1554 = vmatpush3.bf16.xpose.msra.mxu1 %v911_v1  ;;  %1555 = vmatprep.mubr.msk.bf16.mxu1 %vm2111_vm0, %v2110_v0 }
 0x413   : > { %1559 = vmatprep.subr.bf16.mxu1 %v2110_v0 }
 0x419   : > { %1556 = vmatmul.mubr.msk.bf16.vlgmr.msra.gmra.mrb[12].mxu1 %vm794_vm1, %v903_v2 }
 0x41a   : > { %1561 = vmatprep.mubr.msk.bf16.mxu1 %vm2111_vm0, %v2110_v0 }
 0x4e4   : > { %v2561_v3 = vpop.f32.mrb[8].mxu1 }
 0x4e5   : > { %v1551_v4 = vpop.f32.mrb[9].mxu1 }
 0x4e6   : > { %v898_v5 = vpop.f32.mrb[10].mxu1 }
 0x4e7   : > { %v1552_v6 = vpop.f32.mrb[11].mxu1 }
 0x4ec   : > { %v947_v7 = vpop.f32.mrb[12].mxu1 }
 0x4ed   : > { %v1557_v8 = vpop.f32.mrb[13].mxu1  ;;  %v953_v9 = vsel %vm841_vm2, %v947_v7, -inf }
 0x4ee   : > { %954 = vmax.xlane.f32.xlu0 %v953_v9  ;;  %v950_v10 = vpop.f32.mrb[14].mxu1 }
 0x4ef   : > { %v1558_v11 = vpop.f32.mrb[15].mxu1 }
 0x504   : > { %966 = vrot.lane.b32.xlu0 %v2548_v57, %s2112_s16  ;;  %s2116_s16 = smov [#allocation17]  }
 0x508   : > { %1016 = vrot.lane.b32.xlu0 %v2521_v25, %s2113_s22 }
 0x50c   : > { %1014 = vrot.lane.b32.xlu0 %v2525_v30, %s2113_s22 }
 0x57b   : > { %v955_v12 = vpop.xlane.xlu0 %954 }
 0x57c   : > { %v956_v13 = vsub.f32 %v947_v7, %v955_v12 }
 0x57e   : > { %v957_v14 = vmul.f32 1.442695, %v956_v13 }
 0x57f   : > { %v967_v15 = vpop.permute.xlu0 %966 }
 0x580   : > { %1753 = vpow2.f32 %v957_v14  ;;  %v972_v16 = vsel %vm857_vm3, %v967_v15, 0 }
 0x581   : > { %1560 = vmatpush3.bf16.msra.mxu1 %v972_v16 }
 0x582   : > { %1565 = vmatprep.subr.bf16.mxu1 %v2110_v0 }
 0x583   : > { %v1017_v22 = vpop.permute.xlu0 %1016 }
 0x584   : > { %v1022_v24 = vsel %vm794_vm1, %v1017_v22, 0 }
 0x587   : > { %v1015_v25 = vpop.permute.xlu0 %1014 }
 0x58a   : > { %v1754_v17 = vpop.eup %1753 }
 0x58b   : > { %v959_v18 = vsel %vm841_vm2, %v1754_v17, 0.0 }
 0x58c   : > { %960 = vadd.xlane.f32.xlu1 %v959_v18 }
 0x619   : > { %v961_v19 = vpop.xlane.xlu1 %960 }
 0x61a   : > { %1755 = vrcp.f32 %v961_v19 }
 0x624   : > { %v1756_v20 = vpop.eup %1755 }
 0x625   : > { %v963_v21 = vmul.f32 %v1756_v20, %v1754_v17 }
 0x627   : > { %v964_v23 = vpack.c.bf16 %v963_v21, %v963_v21 }
 0x629   : > { %1562 = vmatmul.mubr.msk.bf16.vlgmr.msra.gmra.mrb[16].mxu1 %vm841_vm2, %v964_v23 }
 0x62a   : > { %1566 = vmatpush3.bf16.xpose.msra.mxu1 %v1022_v24  ;;  %1567 = vmatprep.mubr.msk.bf16.mxu1 %vm2111_vm0, %v2110_v0 }
 0x62b   : > { %1571 = vmatprep.subr.bf16.mxu1 %v2110_v0 }
 0x631   : > { %1568 = vmatmul.mubr.msk.bf16.vlgmr.msra.gmra.mrb[20].mxu1 %vm794_vm1, %v1015_v25 }
 0x632   : > { %1573 = vmatprep.mubr.msk.bf16.mxu1 %vm2111_vm0, %v2110_v0 }
 0x6fc   : > { %v1008_v26 = vpop.f32.mrb[16].mxu1 }
 0x6fd   : > { %v1563_v27 = vpop.f32.mrb[17].mxu1 }
 0x6fe   : > { %v1011_v28 = vpop.f32.mrb[18].mxu1 }
 0x6ff   : > { %v1564_v29 = vpop.f32.mrb[19].mxu1 }
 0x704   : > { %v1058_v30 = vpop.f32.mrb[20].mxu1 }
 0x705   : > { %v1569_v31 = vpop.f32.mrb[21].mxu1  ;;  %v1064_v32 = vsel %vm841_vm2, %v1058_v30, -inf }
 0x706   : > { %1065 = vmax.xlane.f32.xlu0 %v1064_v32  ;;  %v1061_v33 = vpop.f32.mrb[22].mxu1 }
 0x707   : > { %v1570_v34 = vpop.f32.mrb[23].mxu1 }
 0x793   : > { %v1066_v35 = vpop.xlane.xlu0 %1065 }
 0x794   : > { %v1067_v36 = vsub.f32 %v1058_v30, %v1066_v35 }
 0x796   : > { %v1068_v37 = vmul.f32 1.442695, %v1067_v36 }
 0x798   : > { %1757 = vpow2.f32 %v1068_v37 }
 0x7a2   : > { %v1758_v38 = vpop.eup %1757 }
 0x7a3   : > { %v1070_v39 = vsel %vm841_vm2, %v1758_v38, 0.0 }
 0x7a4   : > { %1071 = vadd.xlane.f32.xlu1 %v1070_v39 }
 0x7b5   : > { %1076 = vrot.lane.b32.xlu1 %v2548_v57, %s2113_s22  ;;  %v1429_v57 = vld [vmem:[#allocation16] ss:$0 sm:$0xff]  ;;  %s2019_s22 = sshll.u32 %s2116_s16, 4  ;;  %s2020_s22 = int_to_ptr.vmem [resolvable:$false] %s2019_s22 }
 0x7b6   : > { %p2022_p2 = scmp.lt.s32.totalorder %s2598_s21, %s2020_s22 }
 0x7b9   : > { %1125 = vrot.lane.b32.xlu1 %v1008_v26, %s2114_s9  ;;  %s2021_s9 = scalar_lea.vmem %s2020_s22, 256 }
 0x7ba   : > { %p2023_p3 = scmp.lt.s32.totalorder %s2021_s9, %s2015_s15 }
 0x7bc   : > { %p2024_p4 = por %p2023_p3, %p2022_p2 }
 0x7be   : > { %p2025_p10 = pnand %p2024_p4, %p2018_p0 }
 0x831   : > { %v1072_v40 = vpop.xlane.xlu1 %1071 }
 0x832   : > { %1759 = vrcp.f32 %v1072_v40 }
 0x835   : > { %v1077_v41 = vpop.permute.xlu1 %1076 }
 0x836   : > { %v1082_v42 = vsel %vm857_vm3, %v1077_v41, 0 }
 0x837   : > { %1572 = vmatpush3.bf16.msra.mxu1 %v1082_v42 }
 0x839   : > { %v1126_v53 = vpop.permute.xlu1 %1125 }
 0x83a   : > { %v1132_v54 = vsel %vm794_vm1, %v2561_v3, %v1126_v53 }
 0x83c   : > { %v1760_v43 = vpop.eup %1759 }
 0x83d   : > { %v1074_v44 = vmul.f32 %v1760_v43, %v1758_v38 }
 0x83f   : > { %v1075_v45 = vpack.c.bf16 %v1074_v44, %v1074_v44 }
 0x841   : > { %1574 = vmatmul.mubr.msk.bf16.vlgmr.msra.gmra.mrb[24].mxu1 %vm841_vm2, %v1075_v45 }
 0x914   : > { %v1118_v49 = vpop.f32.mrb[24].mxu1 }
 0x915   : > { %1129 = vrot.lane.b32.xlu1 %v1118_v49, %s2115_s25  ;;  %v1575_v50 = vpop.f32.mrb[25].mxu1 }
 0x916   : > { %v1121_v51 = vpop.f32.mrb[26].mxu1 }
 0x917   : > { %v1576_v52 = vpop.f32.mrb[27].mxu1 }
 0x987   : > { %v1130_v55 = vpop.permute.xlu1 %1129 }
 0x988   : > { %v1134_v56 = vsel %vm1133_vm4, %v1132_v54, %v1130_v55 }
 0x989   : > { %v1135_v0 = vpack.c.bf16 %v1134_v56, %v1134_v56 }
 0x98b   : > { %1584 = vmatmul.mubr.msk.bf16.vlgmr.msra.gmra.mrb[8].mxu0 %vm1167_vm5, %v1135_v0 }
 0xa5e   : > { %v1205_v58 = vpop.f32.mrb[8].mxu0 }
 0xa5f   : > { %v1206_v59 = vadd.f32 %v1429_v57, %v1205_v58  ;;  %v1585_v60 = vpop.f32.mrb[9].mxu0 }
 0xa60   : > { %v1208_v61 = vpop.f32.mrb[10].mxu0 }
 0xa61   : > { %1211 = vst [vmem:[%s455_s1] sm:$0xff] %v1206_v59  ;;  %v1586_v62 = vpop.f32.mrb[11].mxu0 }
 0xa62   : > { %2028 = shalt.err (!%p2025_p10)
}
 0xa63   : > { %s2029_s20 = scalar_lea.hbm %s2596_s17, 128  ;;  %s2033_s24 = scalar_lea.hbm %s2678_s14, 256 }
 0xa64   : > { %p2030_p11 = scmp.ne.s32.totalorder %s2596_s17, %s2029_s20  ;;  %p2034_p7 = scmp.lt.u32.totalorder %s2596_s17, %s2678_s14 }
 0xa65   : > { %p2035_p6 = scmp.lt.u32.totalorder %s2033_s24, %s2029_s20  ;;  %p2037_p12 = scmp.lt.u32.totalorder %s2029_s20, %s2596_s17 }
 0xa66   : > { %p2031_p8 = pnand %p2030_p11, %p2679_p1 }
 0xa67   : > { %p2036_p9 = por %p2035_p6, %p2034_p7 }
 0xa68   : > { %p2032_p5 = pneg %p2031_p8 }
 0xa69   : > { %p2038_p13 = por %p2037_p12, %p2036_p9 }
 0xa6b   : > { %p2039_p0 = pnand %p2038_p13, %p2032_p5 }
 0xa6d   : > { %2042 = shalt.err (!%p2039_p0)
}
 0xa6e   : > { %1621 = dma.vmem_to_hbm [thread:$0]  (%p2679_p1), %s2598_s21, 128, %s2596_s17, %s1213_s29  }
 0xa6f PF: > { %s1238_s18 = sand.u32 1, %s2085_s30   ;;  %p2680_p2 = scmp.ne.s32.totalorder %s2667_s28, 0 }
 0xa70   : > { %p2681_p3 = scmp.ge.s32.totalorder %s2097_s12, 2  ;;  %s1239_s15 = scalar_lea.sflag [#allocation4], %s1238_s18 }
 0xa72   : > { %p1653_p4 = pnand %p2681_p3, %p2680_p2 }
 0xa74   : > { %2080 = dma.done.wait (!%p1653_p4), %s1239_s15, 128  }
 0xa75   : > { %2082 = vsyncadd (!%p1653_p4), %s1239_s15, 4294967168  ;;  %p26_p10 = scmp.ge.s32.totalorder %s2392_s19, 4   ;;  %s2682_s30 = smov %s2089_s10 }
 0xa76   : > { %s2683_s10 = smov %s2093_s11  ;;  %s2684_s11 = smov %s2403_s26 }
 0xa77   : > { %s2685_s12 = smov %s2392_s19  ;;  %28 = sbr.rel (!%p26_p10) target bundleno = 12 (0xc), region = 133 }
 0xa7e   :  { %1244 = vsyncpa [#allocation3], 1 }
 0xa7f   :  { %1246 = vsyncpa [#allocation3 + $0x1], 1 }
 0xa80   :  { %1247 = vsyncpa [#allocation6], 1 }
 0xa81   :  { %1248 = vsyncpa [#allocation9], 1 }
 0xa82   :  { %1249 = vsyncpa [#allocation12], 1 }
 0xa83   :  { %1250 = vsyncpa [#allocation15], 1 }
 0xa84   :  { %1251 = vsyncpa [#allocation4], 1 }
 0xa85   :  { %1253 = vsyncpa [#allocation4 + $0x1], 1 }

</bundles_post_ra>
